<compile_context>
chip_gen: v5e
topology: v5e:2x2
jax: 0.10.0
libtpu: 0.0.40
codegen_flags: <defaults>
</compile_context>

<pallas_src>
import functools

import jax
import jax.numpy as jnp
from jax.experimental import pallas as pl
from jax.experimental.pallas import tpu as pltpu


def _actor_kernel(b_ref, seg_ref, x_ref, w_ref, o_ref):
    """One (TR, D) row tile of the flattened state.

    b_ref:   SMEM (3,)         per-segment bias
    seg_ref: VMEM (1, TR) i32  per-row segment id in {0,1,2} (global offsets)
    x_ref:   VMEM (TR, D)      row tile of the flattened (B*3L, D) state
    w_ref:   VMEM (8, D)       projection weights, rows 0..2 valid, rest zero
    o_ref:   VMEM (1, 1, TR)   lane-dense output tile
    """
    x = x_ref[...].astype(jnp.float32)
    w = w_ref[...].astype(jnp.float32)
    # (8, D) @ (TR, D)^T on the MXU -> (8, TR): rows land in lanes (lane-dense).
    s = jax.lax.dot_general(
        w, x, (((1,), (1,)), ((), ())),
        preferred_element_type=jnp.float32,
        precision=jax.lax.Precision.HIGHEST)
    seg = seg_ref[...]                                    # (1, TR) int32
    y = jnp.where(seg == 0, s[0:1] + b_ref[0],
        jnp.where(seg == 1, s[1:2] + b_ref[1],
                            s[2:3] + b_ref[2]))           # (1, TR) f32
    o_ref[0] = jax.nn.sigmoid(y).astype(o_ref.dtype)


def _round_up(x, m):
    return ((x + m - 1) // m) * m


def _pick_row_tile(total_rows, d, *, max_tile_bytes=8 << 20, min_steps=8):
    """Row-tile size for the fused (rows, D) stream.

    Big cdiv-based tiles (multiples of 128 rows -> unmasked lane-dense stores),
    no divisor search and no requirement that the tile divide the row count.
    """
    if total_rows <= 128:
        return _round_up(total_rows, 8)      # one tile; tail padding handles rest
    row_bytes = max(1, d * 4)                # budget in f32 compute width
    cap = max(128, (max_tile_bytes // row_bytes) // 128 * 128)
    tr = min(cap, (total_rows // 128) * 128)
    # Keep >= min_steps grid steps for v7x's 2 TensorCores when that still
    # leaves tiles of >= 1024 rows each.
    per_step = ((total_rows // min_steps) // 128) * 128
    if per_step >= 1024:
        tr = min(tr, per_step)
    return max(tr, 128)


@functools.partial(jax.jit, static_argnames=("length",))
def actor_forward(state, weights, biases, *, length):
    """state: (B, 3*L, D); weights: (3, D); biases: (3,)  ->  (B, 3*L, 1)."""
    B, S, D = state.shape
    L = length
    assert S == 3 * L, "state second dim must be 3 * seqlength"

    R = B * S                                # total flattened rows
    x = state.reshape(R, D)                  # metadata-only collapse of leading dims
    TR = _pick_row_tile(R, D)
    nt = pl.cdiv(R, TR)
    Rp = nt * TR

    # Per-row segment id (0/1/2) from the GLOBAL flattened row index, computed
    # with plain XLA ops (4 B/row) and padded to the tiled length so every
    # kernel block is fully in bounds.
    rows = jnp.arange(Rp, dtype=jnp.int32)
    seg = ((rows % (3 * L)) // L).reshape(1, Rp)

    # Pad weights to 8 sublanes for a clean MXU operand; biases stay in SMEM.
    w_pad = jnp.zeros((8, D), weights.dtype).at[:3, :].set(weights)

    out = pl.pallas_call(
        _actor_kernel,
        out_shape=jax.ShapeDtypeStruct((nt, 1, TR), state.dtype),
        grid_spec=pltpu.PrefetchScalarGridSpec(
            num_scalar_prefetch=0,
            grid=(nt,),
            in_specs=[
                pl.BlockSpec(memory_space=pltpu.MemorySpace.SMEM),   # biases (3,)
                pl.BlockSpec((1, TR), lambda r: (0, r)),             # segment ids
                pl.BlockSpec((TR, D), lambda r: (r, 0)),             # state rows
                pl.BlockSpec((8, D), lambda r: (0, 0)),              # weights
            ],
            out_specs=pl.BlockSpec((1, 1, TR), lambda r: (r, 0, 0)),
        ),
        compiler_params=pltpu.CompilerParams(
            dimension_semantics=("parallel",),
            vmem_limit_bytes=48 << 20),
    )(biases, seg, x, w_pad)

    # (nt, 1, TR) -> (B, 3L, 1); drop the padded tail rows.
    return out.reshape(-1)[:R].reshape(B, S, 1)


def _init_linear_params(key, d_in, d_out):
    """PyTorch nn.Linear default init: U(-1/sqrt(d_in), 1/sqrt(d_in))."""
    kw, kb = jax.random.split(key)
    bound = 1.0 / jnp.sqrt(jnp.float32(d_in))
    w = jax.random.uniform(kw, (d_in, d_out), jnp.float32, -bound, bound)
    b = jax.random.uniform(kb, (d_out,), jnp.float32, -bound, bound)
    return w, b


if __name__ == "__main__":
    # Small shapes implied by the module: args.emb_size = D, args.seqlength = L.
    B, L, D = 2, 8, 32

    key = jax.random.PRNGKey(0)
    k_state, k_t, k_a, k_v = jax.random.split(key, 4)

    state = jax.random.normal(k_state, (B, 3 * L, D), jnp.float32)

    wt, bt = _init_linear_params(k_t, D, 1)   # text_action
    wa, ba = _init_linear_params(k_a, D, 1)   # audio_action
    wv, bv = _init_linear_params(k_v, D, 1)   # vision_action
    weights = jnp.stack([wt[:, 0], wa[:, 0], wv[:, 0]], axis=0)   # (3, D)
    biases = jnp.stack([bt[0], ba[0], bv[0]], axis=0)             # (3,)

    action = actor_forward(state, weights, biases, length=L)
    action = jax.block_until_ready(action)

    # Pure-JAX reference check.
    segs = [state[:, :L], state[:, L:2 * L], state[:, 2 * L:]]
    ref = jnp.concatenate(
        [jax.nn.sigmoid(
            jnp.einsum("bld,do->blo", s, w,
                       precision=jax.lax.Precision.HIGHEST) + b)
         for s, w, b in zip(segs, [wt, wa, wv], [bt, ba, bv])],
        axis=1)

    assert action.shape == (B, 3 * L, 1)
    assert jnp.allclose(action, ref, atol=1e-3, rtol=1e-3), (
        float(jnp.max(jnp.abs(action - ref))))

    # TODO(synk): update_state / predictor (TransformerEncoder stacks, gating
    # MLPs, BatchNorm1d head) are not part of Actor.forward() and are not
    # implemented here.
    print("KERNEL_OK")
</pallas_src>

<mosaic_0001>
module attributes {stable_mosaic.version = 11 : i64} {
  func.func @_actor_kernel(%arg0: i32, %arg1: memref<3xf32, #tpu.memory_space<smem>>, %arg2: memref<1x48xi32, #tpu.memory_space<vmem>>, %arg3: memref<48x32xf32, #tpu.memory_space<vmem>>, %arg4: memref<8x32xf32, #tpu.memory_space<vmem>>, %arg5: memref<1x1x48xf32, #tpu.memory_space<vmem>>) attributes {dimension_semantics = [#tpu.dimension_semantics<parallel>], iteration_bounds = array<i64: 1>, scalar_prefetch = 0 : i64, scratch_operands = 0 : i64, tpu.core_type = #tpu.core_type<tc>, window_params = [{transform_indices = @transform_0, window_bounds = array<i64: 3>}, {transform_indices = @transform_1, window_bounds = array<i64: 1, 48>}, {transform_indices = @transform_2, window_bounds = array<i64: 48, 32>}, {pipeline_mode = #tpu.pipeline_mode<synchronous>, transform_indices = @transform_3, window_bounds = array<i64: 8, 32>}, {transform_indices = @transform_4, window_bounds = array<i64: 1, 1, 48>}]} {
    %c0 = arith.constant 0 : index
    %c0_0 = arith.constant 0 : index
    %0 = vector.load %arg3[%c0, %c0_0] : memref<48x32xf32, #tpu.memory_space<vmem>>, vector<48x32xf32>
    %c0_1 = arith.constant 0 : index
    %c0_2 = arith.constant 0 : index
    %1 = vector.load %arg4[%c0_1, %c0_2] : memref<8x32xf32, #tpu.memory_space<vmem>>, vector<8x32xf32>
    %cst = arith.constant dense<0.000000e+00> : vector<8x48xf32>
    %2 = tpu.matmul %1, %0, %cst {dimension_numbers = #tpu.dot_dimension_numbers<[1], [1], [0], [0], [0, 0, 1, 0], [], []>, precision = #tpu.contract_precision<fp32>} : vector<8x32xf32>, vector<48x32xf32>, vector<8x48xf32> -> vector<8x48xf32>
    %c0_3 = arith.constant 0 : index
    %c0_4 = arith.constant 0 : index
    %3 = vector.load %arg2[%c0_3, %c0_4] : memref<1x48xi32, #tpu.memory_space<vmem>>, vector<1x48xi32>
    %c0_i32 = arith.constant 0 : i32
    %4 = vector.broadcast %c0_i32 : i32 to vector<1x48xi32>
    %5 = arith.cmpi eq, %3, %4 : vector<1x48xi32>
    %6 = vector.extract_strided_slice %2 {offsets = [0, 0], sizes = [1, 48], strides = [1, 1]} : vector<8x48xf32> to vector<1x48xf32>
    %c0_5 = arith.constant 0 : index
    %7 = memref.load %arg1[%c0_5] : memref<3xf32, #tpu.memory_space<smem>>
    %8 = vector.broadcast %7 : f32 to vector<1x48xf32>
    %9 = arith.addf %6, %8 : vector<1x48xf32>
    %c1_i32 = arith.constant 1 : i32
    %10 = vector.broadcast %c1_i32 : i32 to vector<1x48xi32>
    %11 = arith.cmpi eq, %3, %10 : vector<1x48xi32>
    %12 = vector.extract_strided_slice %2 {offsets = [1, 0], sizes = [1, 48], strides = [1, 1]} : vector<8x48xf32> to vector<1x48xf32>
    %c1 = arith.constant 1 : index
    %13 = memref.load %arg1[%c1] : memref<3xf32, #tpu.memory_space<smem>>
    %14 = vector.broadcast %13 : f32 to vector<1x48xf32>
    %15 = arith.addf %12, %14 : vector<1x48xf32>
    %16 = vector.extract_strided_slice %2 {offsets = [2, 0], sizes = [1, 48], strides = [1, 1]} : vector<8x48xf32> to vector<1x48xf32>
    %c2 = arith.constant 2 : index
    %17 = memref.load %arg1[%c2] : memref<3xf32, #tpu.memory_space<smem>>
    %18 = vector.broadcast %17 : f32 to vector<1x48xf32>
    %19 = arith.addf %16, %18 : vector<1x48xf32>
    %20 = arith.select %11, %15, %19 : vector<1x48xi1>, vector<1x48xf32>
    %21 = arith.select %5, %9, %20 : vector<1x48xi1>, vector<1x48xf32>
    %22 = arith.negf %21 : vector<1x48xf32>
    %23 = math.exp %22 : vector<1x48xf32>
    %cst_6 = arith.constant 1.000000e+00 : f32
    %24 = vector.broadcast %cst_6 : f32 to vector<1x48xf32>
    %25 = arith.addf %24, %23 : vector<1x48xf32>
    %26 = arith.divf %24, %25 : vector<1x48xf32>
    %c0_7 = arith.constant 0 : index
    %c0_8 = arith.constant 0 : index
    %c0_9 = arith.constant 0 : index
    %27 = vector.load %arg5[%c0_7, %c0_8, %c0_9] : memref<1x1x48xf32, #tpu.memory_space<vmem>>, vector<1x1x48xf32>
    %28 = vector.shape_cast %27 : vector<1x1x48xf32> to vector<1x48xf32>
    %29 = vector.shape_cast %26 : vector<1x48xf32> to vector<1x1x48xf32>
    tpu.vector_store %arg5[%c0_7, %c0_8, %c0_9], %29 {strides = array<i32>} : memref<1x1x48xf32, #tpu.memory_space<vmem>>, vector<1x1x48xf32>,
    return
  }
  func.func @transform_0(%arg0: i32) -> i32 {
    %c0_i32 = arith.constant 0 : i32
    %c0_i32_0 = arith.constant 0 : i32
    return %c0_i32 : i32
  }
  func.func @transform_1(%arg0: i32) -> (i32, i32) {
    %c0_i32 = arith.constant 0 : i32
    %c0_i32_0 = arith.constant 0 : i32
    return %c0_i32, %arg0 : i32, i32
  }
  func.func @transform_2(%arg0: i32) -> (i32, i32) {
    %c0_i32 = arith.constant 0 : i32
    %c0_i32_0 = arith.constant 0 : i32
    return %arg0, %c0_i32 : i32, i32
  }
  func.func @transform_3(%arg0: i32) -> (i32, i32) {
    %c0_i32 = arith.constant 0 : i32
    %c0_i32_0 = arith.constant 0 : i32
    %c0_i32_1 = arith.constant 0 : i32
    return %c0_i32, %c0_i32_0 : i32, i32
  }
  func.func @transform_4(%arg0: i32) -> (i32, i32, i32) {
    %c0_i32 = arith.constant 0 : i32
    %c0_i32_0 = arith.constant 0 : i32
    %c0_i32_1 = arith.constant 0 : i32
    return %arg0, %c0_i32, %c0_i32_0 : i32, i32, i32
  }
}

</mosaic_0001>

<bundles_post_ra>
// kernel: actor_forward.1
= control target key start
LH: loop header
LB: loop body
LE: loop exit
PB: predicated region body
PF: predicated region fallthrough
CT: control target
= control target key end

     0   :  { %9 = vsyncpa [#allocation4], 0  ;;  %s463_s0 = inlined_call_operand.vmem [shape: f32[3], index: 0, kind: input, shape index: {}]   ;;  %s464_s1 = inlined_call_operand.vmem [shape: s32[1,48], index: 1, kind: input, shape index: {}]   ;;  %s465_s2 = inlined_call_operand.hbm [shape: f32[48,32], index: 2, kind: input, shape index: {}]   ;;  %s466_s3 = inlined_call_operand.vmem [shape: f32[8,32], index: 3, kind: input, shape index: {}]   ;;  %s467_s4 = inlined_call_operand.vmem [shape: f32[1,1,48], index: 4, kind: output, shape index: {}]  }
   0x1   :  { %s16_s17 = sshll.u32 %s463_s0, 4  ;;  %s17_s17 = int_to_ptr.vmem [resolvable:$true] %s16_s17 }
   0x2   :  { %10 = vsyncpa [#allocation3], 0  ;;  %s26_s20 = sshll.u32 %s465_s2, 4  ;;  %s388_s21 = smov [#allocation2]   ;;  %s27_s20 = int_to_ptr.hbm [resolvable:$true] %s26_s20 }
   0x3   :  { %19 = dma.vmem_to_smem %s17_s17, 16, %s388_s21, [#allocation4]  }
   0x4   :  { %s389_s22 = smov [#allocation5]   ;;  %s390_s24 = smov 128  }
   0x5   :  { %s28_s23 = sshll.u32 %s389_s22, 4  ;;  %s391_s25 = smov 8   ;;  %s29_s23 = int_to_ptr.vmem [resolvable:$true] %s28_s23 }
   0x6   :  { %34 = dma.hbm_to_vmem [thread:$0]  %s27_s20, 768, %s29_s23, [#allocation3], %s390_s24, %s390_s24, %s391_s25  }
   0x7   :  { %384 = dma.done.wait [#allocation4], 16  }
   0x8   :  { %385 = vsyncadd [#allocation4], 4294967280 }
   0x9   :  { %386 = dma.done.wait [#allocation3], 768  }
   0xa   :  { %387 = vsyncadd [#allocation3], 4294966528 }
   0xb   :  { %45 = sfence }
   0xc   :  { %v51_v0 = vld [vmem:[#allocation5 + $0x28] sm:$0xff]  ;;  %vm53_vm0 = vcmask 261120   ;;  %v50_v1 = vld [vmem:[#allocation5 + $0x20] sm:$0xff]  ;;  %v49_v2 = vld [vmem:[#allocation5 + $0x18] sm:$0xff]  ;;  %s338_s26 = sld [smem:[#allocation2 + $0x2]]  ;;  %vm329_vm6 = vcmask 385024  }
   0xd   :  { %v73_v3 = vsel %vm53_vm0, %v51_v0, 0  ;;  %v70_v4 = vsel %vm53_vm0, %v50_v1, 0  ;;  %v67_v5 = vsel %vm53_vm0, %v49_v2, 0  ;;  %v48_v6 = vld [vmem:[#allocation5 + $0x10] sm:$0xff]  ;;  %v47_v7 = vld [vmem:[#allocation5 + $0x8] sm:$0xff]  ;;  %v52_v12 = vld [vmem:[%s466_s3] sm:$0xff] }
   0xe   :  { %v426_v8 = vand.u32 4294901760, %v73_v3  ;;  %v428_v9 = vand.u32 4294901760, %v70_v4  ;;  %v430_v10 = vand.u32 4294901760, %v67_v5  ;;  %v64_v11 = vsel %vm53_vm0, %v48_v6, 0  ;;  %v46_v18 = vld [vmem:[#allocation5] sm:$0xff]  ;;  %s337_s3 = sld [smem:[#allocation2 + $0x1]] }
   0xf   :  { %v436_v13 = vand.u32 4294901760, %v64_v11  ;;  %v61_v14 = vsel %vm53_vm0, %v47_v7, 0  ;;  %v55_v19 = vsel %vm53_vm0, %v52_v12, 0  ;;  %v58_v23 = vsel %vm53_vm0, %v46_v18, 0  ;;  %s288_s27 = sld [smem:[#allocation2]] }
  0x10   :  { %86 = vmatpush.xpose.msra.mxu0 %v426_v8  ;;  %v117_v15 = vsub.f32 %v73_v3, %v426_v8  ;;  %v123_v16 = vsub.f32 %v70_v4, %v428_v9  ;;  %v129_v17 = vsub.f32 %v67_v5, %v430_v10  ;;  %202 = vmatpush.xpose.msra.mxu3 %v426_v8  ;;  %v93_v22 = vand.u32 4294901760, %v61_v14  ;;  %v286_v1 = vld [vmem:[%s464_s1] sm:$0x1] }
  0x11   :  { %v97_v24 = vand.u32 4294901760, %v55_v19  ;;  %v135_v28 = vsub.f32 %v64_v11, %v436_v13  ;;  %v95_v30 = vand.u32 4294901760, %v58_v23  ;;  %vm291_vm1 = vcmp.eq.s32.totalorder %v286_v1, 1 }
  0x12   :  { %v118_v20 = vand.u32 4294901760, %v117_v15  ;;  %v124_v21 = vand.u32 4294901760, %v123_v16  ;;  %169 = vmatpush.xpose.msra.mxu2 %v117_v15  ;;  %v130_v27 = vand.u32 4294901760, %v129_v17  ;;  %v141_v35 = vsub.f32 %v61_v14, %v93_v22 }
  0x13   :  { %v98_v31 = vsub.f32 %v55_v19, %v97_v24  ;;  %v136_v34 = vand.u32 4294901760, %v135_v28  ;;  %v147_v40 = vsub.f32 %v58_v23, %v95_v30  ;;  %v296_v62 = vstv %s338_s26 }
  0x14   :  { %88 = vmatpush.xpose.msra.mxu0 %v428_v9  ;;  %v119_v25 = vsub.f32 %v117_v15, %v118_v20  ;;  %v125_v26 = vsub.f32 %v123_v16, %v124_v21  ;;  %204 = vmatpush.xpose.msra.mxu3 %v428_v9  ;;  %v131_v33 = vsub.f32 %v129_v17, %v130_v27  ;;  %v142_v39 = vand.u32 4294901760, %v141_v35 }
  0x15   :  { %v99_v36 = vand.u32 4294901760, %v98_v31  ;;  %v137_v38 = vsub.f32 %v135_v28, %v136_v34  ;;  %v148_v44 = vand.u32 4294901760, %v147_v40  ;;  %v293_v59 = vstv %s337_s3 }
  0x16   :  { %v120_v29 = vand.u32 4294901760, %v119_v25  ;;  %172 = vmatpush.xpose.msra.mxu2 %v123_v16  ;;  %v126_v32 = vand.u32 4294901760, %v125_v26  ;;  %v132_v37 = vand.u32 4294901760, %v131_v33  ;;  %v143_v43 = vsub.f32 %v141_v35, %v142_v39 }
  0x17   :  { %v100_v41 = vsub.f32 %v98_v31, %v99_v36  ;;  %v138_v42 = vand.u32 4294901760, %v137_v38  ;;  %v149_v47 = vsub.f32 %v147_v40, %v148_v44  ;;  %v289_v2 = vstv %s288_s27 }
  0x18   :  { %121 = vmatpush.xpose.msra.mxu1 %v120_v29  ;;  %90 = vmatpush.xpose.msra.mxu0 %v430_v10  ;;  %v144_v46 = vand.u32 4294901760, %v143_v43  ;;  %vm287_vm2 = vcmp.eq.s32.totalorder %v286_v1, 0 }
  0x19   :  { %206 = vmatpush.xpose.msra.mxu3 %v430_v10  ;;  %v101_v45 = vand.u32 4294901760, %v100_v41  ;;  %v150_v48 = vand.u32 4294901760, %v149_v47 }
  0x1a   :  { %175 = vmatpush.xpose.msra.mxu2 %v129_v17 }
  0x1c   :  { %127 = vmatpush.xpose.msra.mxu1 %v126_v32  ;;  %92 = vmatpush.xpose.msra.mxu0 %v436_v13 }
  0x1d   :  { %208 = vmatpush.xpose.msra.mxu3 %v436_v13 }
  0x1e   :  { %178 = vmatpush.xpose.msra.mxu2 %v135_v28 }
  0x20   :  { %133 = vmatpush.xpose.msra.mxu1 %v132_v37  ;;  %94 = vmatpush.xpose.msra.mxu0 %v93_v22 }
  0x21   :  { %210 = vmatpush.xpose.msra.mxu3 %v93_v22 }
  0x22   :  { %181 = vmatpush.xpose.msra.mxu2 %v141_v35 }
  0x24   :  { %139 = vmatpush.xpose.msra.mxu1 %v138_v42  ;;  %96 = vmatpush.xpose.msra.mxu0 %v95_v30 }
  0x25   :  { %212 = vmatpush.xpose.msra.mxu3 %v95_v30 }
  0x26   :  { %184 = vmatpush.xpose.msra.mxu2 %v147_v40 }
  0x27   :  { %102 = vmatmul.f32.vlgmr.msra.gmra.mxu0 %v101_v45 }
  0x28   :  { %233 = vmatpush.xpose.msrb.mxu0 %v118_v20  ;;  %145 = vmatpush.xpose.msra.mxu1 %v144_v46 }
  0x29   :  { %216 = vmatmul.f32.vlgmr.msra.gmra.mxu3 %v99_v36  ;;  %187 = vmatmul.f32.vlgmr.msra.gmra.mxu2 %v98_v31 }
  0x2c   :  { %237 = vmatpush.xpose.msrb.mxu0 %v124_v21  ;;  %151 = vmatpush.xpose.msra.mxu1 %v150_v48 }
  0x2f   :  { %153 = vmatmul.f32.vlgmr.msra.gmra.mxu1 %v97_v24 }
  0x30   :  { %270 = vmatpush.xpose.msrb.mxu1 %v426_v8  ;;  %241 = vmatpush.xpose.msrb.mxu0 %v130_v27 }
  0x34   :  { %272 = vmatpush.xpose.msrb.mxu1 %v428_v9  ;;  %245 = vmatpush.xpose.msrb.mxu0 %v136_v34 }
  0x38   :  { %274 = vmatpush.xpose.msrb.mxu1 %v430_v10  ;;  %249 = vmatpush.xpose.msrb.mxu0 %v142_v39 }
  0x3c   :  { %276 = vmatpush.xpose.msrb.mxu1 %v436_v13  ;;  %253 = vmatpush.xpose.msrb.mxu0 %v148_v44 }
  0x3f   :  { %255 = vmatmul.f32.vlgmr.msrb.gmra.mxu0 %v97_v24 }
  0x40   :  { %278 = vmatpush.xpose.msrb.mxu1 %v93_v22 }
  0x44   :  { %280 = vmatpush.xpose.msrb.mxu1 %v95_v30 }
  0x47   :  { %282 = vmatmul.f32.vlgmr.msrb.gmra.mxu1 %v97_v24 }
  0xa4   :  { %v103_v50 = vpop.f32.mrf.mxu0 }
  0xac   :  { %v154_v49 = vpop.f32.mrf.mxu1  ;;  %v188_v52 = vpop.f32.mrf.mxu2 }
  0xad   :  { %v155_v51 = vadd.f32 %v154_v49, %v103_v50  ;;  %v217_v54 = vpop.f32.mrf.mxu3 }
  0xaf   :  { %v189_v53 = vadd.f32 %v188_v52, %v155_v51 }
  0xb1   :  { %v218_v55 = vadd.f32 %v217_v54, %v189_v53 }
  0xbc   :  { %v256_v56 = vpop.f32.mrf.mxu0 }
  0xbd   :  { %v257_v57 = vadd.f32 %v256_v56, %v218_v55 }
  0xc4   :  { %v283_v58 = vpop.f32.mrf.mxu1 }
  0xc5   :  { %v284_v60 = vadd.f32 %v283_v58, %v257_v57 }
  0xc7   :  { %v294_v61 = vadd.f32 %v293_v59, %v284_v60  ;;  %v297_v63 = vadd.f32 %v296_v62, %v284_v60  ;;  %v290_v3 = vadd.f32 %v289_v2, %v284_v60 }
  0xc9   :  { %299 = vst [vmem:[#allocation1] sm:$0xff] %v294_v61 }
  0xd0   :  { %v301_v0 = vld [vmem:[#allocation1 + $0x1] ss:$9 sm:$0xff] }
  0xd1   :  { %304 = vst [vmem:[#allocation1] sm:$0xff] %v297_v63 }
  0xd8   :  { %v306_v4 = vld [vmem:[#allocation1 + $0x2] ss:$9 sm:$0xff] }
  0xd9   :  { %v308_v5 = vsel %vm291_vm1, %v301_v0, %v306_v4 }
  0xda   :  { %v309_v6 = vsel %vm287_vm2, %v290_v3, %v308_v5 }
  0xdb   :  { %v339_v7 = vmul.f32 -1.442695, %v309_v6 }
  0xdd   :  { %344 = vpow2.f32 %v339_v7 }
  0xe3   :  { %v345_v8 = vpop.eup %344 }
  0xe4   :  { %v313_v9 = vadd.f32 1.0, %v345_v8 }
  0xe6   :  { %346 = vrcp.f32 %v313_v9  ;;  %v325_v13 = vand.u32 2147483648, %v313_v9  ;;  %v323_v15 = vand.u32 2147483647, %v313_v9  ;;  %vm319_vm4 = vweird.f32 %v313_v9 }
  0xe8   :  { %v326_v17 = vor.u32 1.1754944e-38, %v325_v13  ;;  %vm324_vm7 = vcmp.eq.f32.partialorder %v323_v15, 8.507059e+37 }
  0xec   :  { %v347_v10 = vpop.eup %346 }
  0xed   :  { %v315_v11 = vmul.f32 %v347_v10, %v313_v9  ;;  %vm320_vm3 = vweird.f32 %v347_v10 }
  0xee   :  { %vm321_vm5 = vmor %vm319_vm4, %vm320_vm3 }
  0xef   :  { %v316_v12 = vsub.f32 1.0, %v315_v11 }
  0xf1   :  { %v317_v14 = vmul.f32 %v347_v10, %v316_v12 }
  0xf3   :  { %v318_v16 = vadd.f32 %v347_v10, %v317_v14 }
  0xf5   :  { %v322_v18 = vsel %vm321_vm5, %v347_v10, %v318_v16 }
  0xf6   :  { %v327_v19 = vsel %vm324_vm7, %v326_v17, %v322_v18 }
  0xf7   :  { %330 = vst.msk [vmem:[%s467_s4] sm:$0x1] %vm329_vm6, %v327_v19 }
  0xf8   :  { %335 = vsyncpa [#allocation3], 1 }
  0xf9   :  { %336 = vsyncpa [#allocation4], 1 }

</bundles_post_ra>
